<compile_context>
chip_gen: v6e
topology: v6e:2x2x1
jax: 0.10.0
libtpu: 0.0.40
codegen_flags: <defaults>
</compile_context>

<pallas_src>
import functools

import jax
import jax.numpy as jnp
from jax import lax
from jax.experimental import pallas as pl
from jax.experimental.pallas import tpu as pltpu

_LANE = 128
_SUBLANE = 8


def _ceil_to(x, m):
    return (x + m - 1) // m * m


# ---------------------------------------------------------------------------
# One-time probe: pltpu.roll rotation direction (so the lane shifts that bring
# gate k*H to lane 0 are correct regardless of the underlying rotate convention).
# ---------------------------------------------------------------------------
def _roll_probe_kernel(x_ref, o_ref):
    o_ref[...] = pltpu.roll(x_ref[...], shift=1, axis=1)


def probe_roll_shifts(hidden, gate_width):
    """Return pltpu.roll shifts that move lanes H, 2H, 3H to lane 0."""
    x = lax.broadcasted_iota(jnp.float32, (_SUBLANE, _LANE), 1)
    y = pl.pallas_call(
        _roll_probe_kernel,
        out_shape=jax.ShapeDtypeStruct((_SUBLANE, _LANE), jnp.float32),
    )(x)
    first = int(y[0, 0])
    if first == _LANE - 1:       # jnp.roll convention: result[i] = x[i - shift]
        def to_front(off): return (gate_width - off) % gate_width
    elif first == 1:             # opposite convention: result[i] = x[i + shift]
        def to_front(off): return off % gate_width
    else:
        raise RuntimeError(f"unexpected pltpu.roll semantics (probe value {first})")
    return tuple(to_front(k * hidden) for k in (1, 2, 3))


# ---------------------------------------------------------------------------
# Fused kernel: all LSTM layers + Linear(H, 1) head in one invocation.
# ---------------------------------------------------------------------------
def _fused_lstm_kernel(x_ref, wih0_ref, wihr_ref, whh_ref, bias_ref,
                       wlin_ref, blin_ref, out_ref, gates_a, gates_b,
                       *, b_pad, hidden, shifts):
    tb = x_ref.shape[0]                      # T * B_pad
    num_layers = whh_ref.shape[0]
    hp = whh_ref.shape[1]                    # padded hidden lane width (128)
    t_steps = tb // b_pad
    sh_f, sh_g, sh_o = shifts                # lane shifts bringing f/g/o onto i lanes

    # Layer-0 input projection (+ combined bias) for ALL timesteps: one hoisted MXU
    # GEMM, bf16 inputs / f32 accumulation, off the serial recurrence path.
    gates_a[...] = (
        jnp.dot(x_ref[...], wih0_ref[...], preferred_element_type=jnp.float32)
        + bias_ref[0])

    cur, nxt = gates_a, gates_b
    h_last = None
    for layer in range(num_layers):          # L is small & static -> unrolled
        whh_l = whh_ref[layer]               # hoisted (HP, 4H) bf16 load
        has_next = layer + 1 < num_layers
        if has_next:
            wih_next = wihr_ref[layer]       # W_ih of layer+1, (HP, 4H) bf16
            bias_next = bias_ref[layer + 1]

        h_b = None                           # bf16 copy of previous h_t
        c = jnp.zeros((b_pad, hp), jnp.float32)

        # T is small & static: fully unrolled -> zero-cost static slices and full
        # LLO scheduling visibility across timesteps.
        for t in range(t_steps):
            row = t * b_pad
            xg = cur[pl.ds(row, b_pad), :]
            if t == 0:
                g = xg                       # h0 == 0 -> skip the W_hh matmul
            else:
                g = xg + jnp.dot(h_b, whh_l, preferred_element_type=jnp.float32)

            # All 4 gates live in ONE 128-lane block: 2 full-vreg EUP tanh ops,
            # then XLU rolls align f/g/o onto the i lanes. Lanes >= H of c/h hold
            # garbage; every consuming weight row/lane is zero there.
            sg = 0.5 * jnp.tanh(0.5 * g) + 0.5     # sigmoid over the whole vreg
            th = jnp.tanh(g)
            i_g = sg
            f_g = pltpu.roll(sg, shift=sh_f, axis=1)
            g_g = pltpu.roll(th, shift=sh_g, axis=1)
            o_g = pltpu.roll(sg, shift=sh_o, axis=1)

            c = f_g * c + i_g * g_g
            h = o_g * jnp.tanh(c)
            h_b = h.astype(jnp.bfloat16)

            if has_next:
                # Interleave the NEXT layer's input projection with this layer's
                # latency-bound recurrence: the MXU is otherwise idle here.
                nxt[pl.ds(row, b_pad), :] = (
                    jnp.dot(h_b, wih_next, preferred_element_type=jnp.float32)
                    + bias_next)
            h_last = h
        cur, nxt = nxt, cur

    # Linear(H, 1) head fused as a VPU multiply + lane reduction (padded lanes of
    # both h_last and w_lin are zero / zero-weighted, so they do not contribute).
    out_ref[...] = (jnp.sum(h_last * wlin_ref[...], axis=-1, keepdims=True)
                    + blin_ref[...])


def _fused_forward(x_flat, wih0, wihr, whh, bias, wlin, blin, *,
                   b_pad, hidden, shifts):
    tb = x_flat.shape[0]
    gp = whh.shape[-1]
    return pl.pallas_call(
        functools.partial(_fused_lstm_kernel, b_pad=b_pad, hidden=hidden,
                          shifts=shifts),
        out_shape=jax.ShapeDtypeStruct((b_pad, 1), jnp.float32),
        scratch_shapes=[
            pltpu.VMEM((tb, gp), jnp.float32),   # current layer's precomputed gates
            pltpu.VMEM((tb, gp), jnp.float32),   # next layer's gates (built in-loop)
        ],
    )(x_flat, wih0, wihr, whh, bias, wlin, blin)


# ---------------------------------------------------------------------------
# Parameters (PyTorch nn.LSTM layout) and TPU-friendly packing.
# ---------------------------------------------------------------------------
def init_params(key, input_size, hidden_size, num_layers):
    """PyTorch-style U(-1/sqrt(H), 1/sqrt(H)) init, gate order i, f, g, o."""
    H = hidden_size
    bound = 1.0 / jnp.sqrt(jnp.float32(H))
    layers = []
    for layer in range(num_layers):
        d_in = input_size if layer == 0 else H
        key, k1, k2, k3, k4 = jax.random.split(key, 5)
        layers.append({
            "w_ih": jax.random.uniform(k1, (4 * H, d_in), jnp.float32, -bound, bound),
            "w_hh": jax.random.uniform(k2, (4 * H, H), jnp.float32, -bound, bound),
            "b_ih": jax.random.uniform(k3, (4 * H,), jnp.float32, -bound, bound),
            "b_hh": jax.random.uniform(k4, (4 * H,), jnp.float32, -bound, bound),
        })
    key, k5, k6 = jax.random.split(key, 3)
    w_lin = jax.random.uniform(k5, (1, H), jnp.float32, -bound, bound)
    b_lin = jax.random.uniform(k6, (1,), jnp.float32, -bound, bound)
    return {"layers": layers, "w_lin": w_lin, "b_lin": b_lin}


def pack_params(params, input_size, hidden_size):
    """Pad/repack weights: 4 gates compacted into one lane block, bf16 MXU weights."""
    H = hidden_size
    GP = _ceil_to(4 * H, _LANE)          # compact gate width (128 for H=32)
    HP = _ceil_to(H, _LANE)              # lane width of the h/c vregs
    IDP = _ceil_to(max(input_size, 1), _LANE)

    def pack_cols(w_t, rows_pad):
        # w_t: (rows, 4H) -> (rows_pad, GP); gates stay contiguous at cols [0, 4H).
        rows = w_t.shape[0]
        out = jnp.zeros((rows_pad, GP), jnp.float32)
        return out.at[:rows, :4 * H].set(w_t)

    layers = params["layers"]
    wih0 = pack_cols(layers[0]["w_ih"].T, IDP)                 # (IDP, GP)
    wihr, whh, bias = [], [], []
    for li, layer in enumerate(layers):
        whh.append(pack_cols(layer["w_hh"].T, HP))             # (HP, GP)
        bias.append(pack_cols((layer["b_ih"] + layer["b_hh"])[None, :], 1))
        if li >= 1:
            wihr.append(pack_cols(layer["w_ih"].T, HP))        # (HP, GP)
    if not wihr:                                               # dummy for L == 1
        wihr.append(jnp.zeros((HP, GP), jnp.float32))

    return {
        "wih0": wih0.astype(jnp.bfloat16),                     # (IDP, GP) bf16
        "wihr": jnp.stack(wihr).astype(jnp.bfloat16),          # (L-1|1, HP, GP) bf16
        "whh": jnp.stack(whh).astype(jnp.bfloat16),            # (L, HP, GP) bf16
        "bias": jnp.stack(bias),                               # (L, 1, GP) f32
        "w_lin": jnp.zeros((1, HP), jnp.float32).at[:, :H].set(params["w_lin"]),
        "b_lin": params["b_lin"][None, :],                     # (1, 1) f32
    }


@functools.partial(jax.jit, static_argnames=("hidden", "roll_shifts"))
def multivariate_lstm_forward(packed, x_btd, *, hidden, roll_shifts):
    """x_btd: (B, T, D) batch_first, like the PyTorch module. Returns (B, 1)."""
    B, T, D = x_btd.shape
    IDP = packed["wih0"].shape[0]
    # NOTE(v6e): up to ~256 independent sequences can be packed into the batch-row
    # dimension before padding; they ride the same MXU passes essentially for free.
    B_pad = _ceil_to(B, _SUBLANE)

    # batch_first -> time-major, pad batch to 8 sublanes and features to IDP lanes,
    # flatten to (T*B_pad, IDP) and cast to bf16 for the hoisted layer-0 GEMM.
    x_tbd = jnp.transpose(x_btd, (1, 0, 2)).astype(jnp.float32)    # (T, B, D)
    x_pad = jnp.zeros((T, B_pad, IDP), jnp.float32).at[:, :B, :D].set(x_tbd)
    x_flat = x_pad.reshape(T * B_pad, IDP).astype(jnp.bfloat16)

    out = _fused_forward(x_flat, packed["wih0"], packed["wihr"], packed["whh"],
                         packed["bias"], packed["w_lin"], packed["b_lin"],
                         b_pad=B_pad, hidden=hidden, shifts=roll_shifts)
    return out[:B]


# ---------------------------------------------------------------------------
# Pure-JAX f32 reference (correctness check) from the raw PyTorch-layout params.
# ---------------------------------------------------------------------------
def reference_forward(params, x_btd):
    x = jnp.transpose(x_btd, (1, 0, 2)).astype(jnp.float32)        # (T, B, D)
    B = x.shape[1]
    for layer in params["layers"]:
        H = layer["w_hh"].shape[1]
        wih_t, whh_t = layer["w_ih"].T, layer["w_hh"].T
        bias = (layer["b_ih"] + layer["b_hh"])[None, :]

        def step(carry, x_t, wih_t=wih_t, whh_t=whh_t, bias=bias, H=H):
            h, c = carry
            gates = x_t @ wih_t + h @ whh_t + bias
            i = jax.nn.sigmoid(gates[:, 0 * H:1 * H])
            f = jax.nn.sigmoid(gates[:, 1 * H:2 * H])
            g = jnp.tanh(gates[:, 2 * H:3 * H])
            o = jax.nn.sigmoid(gates[:, 3 * H:4 * H])
            c = f * c + i * g
            h = o * jnp.tanh(c)
            return (h, c), h

        init = (jnp.zeros((B, H), jnp.float32), jnp.zeros((B, H), jnp.float32))
        _, x = lax.scan(step, init, x)
    return x[-1] @ params["w_lin"].T + params["b_lin"][None, :]


if __name__ == "__main__":
    B, T, D, H, L = 2, 8, 4, 32, 2      # batch, seq, input_size, hidden_size, num_layers

    key = jax.random.PRNGKey(0)
    key, kx = jax.random.split(key)
    x = jax.random.normal(kx, (B, T, D), jnp.float32)

    params = init_params(key, input_size=D, hidden_size=H, num_layers=L)
    packed = pack_params(params, input_size=D, hidden_size=H)

    roll_shifts = probe_roll_shifts(H, packed["whh"].shape[-1])

    out = multivariate_lstm_forward(packed, x, hidden=H, roll_shifts=roll_shifts)
    out = jax.block_until_ready(out)

    ref = reference_forward(params, x)
    assert out.shape == (B, 1), out.shape
    # bf16 MXU inputs (f32 accumulation) vs f32 reference: relaxed tolerance.
    assert jnp.allclose(out, ref, atol=3e-2, rtol=3e-2), (out, ref)

    print("KERNEL_OK")
</pallas_src>

<mosaic_0001>
module attributes {stable_mosaic.version = 11 : i64} {
  func.func @_roll_probe_kernel(%arg0: memref<8x128xf32, #tpu.memory_space<vmem>>, %arg1: memref<8x128xf32, #tpu.memory_space<vmem>>) attributes {dimension_semantics = [], scalar_prefetch = 0 : i64, scratch_operands = 0 : i64, tpu.core_type = #tpu.core_type<tc>} {
    %c0 = arith.constant 0 : index
    %c0_0 = arith.constant 0 : index
    %0 = vector.load %arg0[%c0, %c0_0] : memref<8x128xf32, #tpu.memory_space<vmem>>, vector<8x128xf32>
    %c1_i32 = arith.constant 1 : i32
    %1 = tpu.dynamic_rotate %0 by %c1_i32 dim 1 : vector<8x128xf32>, i32 -> vector<8x128xf32>
    %c0_1 = arith.constant 0 : index
    %c0_2 = arith.constant 0 : index
    %2 = vector.load %arg1[%c0_1, %c0_2] : memref<8x128xf32, #tpu.memory_space<vmem>>, vector<8x128xf32>
    tpu.vector_store %arg1[%c0_1, %c0_2], %1 {strides = array<i32>} : memref<8x128xf32, #tpu.memory_space<vmem>>, vector<8x128xf32>,
    return
  }
}

</mosaic_0001>

<bundles_post_ra>
// kernel: tpu_custom_call.1
= control target key start
LH: loop header
LB: loop body
LE: loop exit
PB: predicated region body
PF: predicated region fallthrough
CT: control target
= control target key end

     0   :  { %6 = vsyncpa [#allocation3], 0  ;;  %s106_s0 = inlined_call_operand.hbm [shape: f32[8,128], index: 0, kind: input, shape index: {}]   ;;  %s107_s1 = inlined_call_operand.hbm [shape: f32[8,128], index: 1, kind: output, shape index: {}]  }
   0x1   :  { %7 = vsyncpa [#allocation4], 0  ;;  %s87_s6 = smov [#allocation2]  }
   0x2   :  { %s14_s7 = sshll.u32 %s87_s6, 4  ;;  %s15_s7 = int_to_ptr.vmem [resolvable:$true] %s14_s7 }
   0x3   :  { %s51_s8 = scalar_lea.vmem %s15_s7, 128  ;;  %p56_p1 = scmp.lt.s32.totalorder %s15_s7, %s15_s7 }
   0x4   :  { %p52_p0 = scmp.ne.s32.totalorder %s15_s7, %s51_s8  ;;  %p57_p2 = scmp.lt.s32.totalorder %s51_s8, %s51_s8 }
   0x6   :  { %p58_p3 = por %p57_p2, %p56_p1 }
   0x8   :  { %p59_p4 = pnand %p58_p3, %p52_p0 }
   0xa   :  { %62 = shalt.err (!%p59_p4)
}
   0xb   :  { %17 = dma.hbm_to_vmem [thread:$0]  %s106_s0, 128, %s15_s7, [#allocation3]  }
   0xc   :  { %83 = dma.done.wait [#allocation3], 128  }
   0xd   :  { %84 = vsyncadd [#allocation3], 4294967168  ;;  %v21_v0 = vld [vmem:[#allocation2] sm:$0xff]  ;;  %s88_s11 = smov 1   ;;  %s89_s12 = smov [#allocation5]  }
   0xe   :  { %22 = vrot.lane.b32.xlu0 %v21_v0, %s88_s11  ;;  %s31_s13 = sshll.u32 %s89_s12, 4  ;;  %s32_s13 = int_to_ptr.vmem [resolvable:$true] %s31_s13 }
   0xf   :  { %s63_s14 = scalar_lea.vmem %s32_s13, 128  ;;  %p68_p6 = scmp.lt.s32.totalorder %s32_s13, %s32_s13 }
  0x10   :  { %p64_p5 = scmp.ne.s32.totalorder %s32_s13, %s63_s14  ;;  %p69_p7 = scmp.lt.s32.totalorder %s63_s14, %s63_s14 }
  0x12   :  { %p70_p8 = por %p69_p7, %p68_p6 }
  0x14   :  { %p71_p9 = pnand %p70_p8, %p64_p5 }
  0x80   :  { %v23_v1 = vpop.permute.xlu0 %22 }
  0x81   :  { %24 = vst [vmem:[#allocation5] sm:$0xff] %v23_v1 }
  0x82   :  { %74 = shalt.err (!%p71_p9)
}
  0x83   :  { %34 = dma.vmem_to_hbm [thread:$0]  %s32_s13, 128, %s107_s1, [#allocation4]  }
  0x84   :  { %85 = dma.done.wait [#allocation4], 128  }
  0x85   :  { %86 = vsyncadd [#allocation4], 4294967168 }
  0x86   :  { %38 = vsyncpa [#allocation3], 1 }
  0x87   :  { %39 = vsyncpa [#allocation4], 1 }

</bundles_post_ra>
